<compile_context>
chip_gen: v7x
topology: tpu7x:2x2x1
jax: 0.10.0
libtpu: 0.0.40
codegen_flags: <defaults>
</compile_context>

<pallas_src>
import math

import jax
import jax.numpy as jnp
from jax import lax
from jax.experimental import pallas as pl
from jax.experimental.pallas import tpu as pltpu

EPS = 1e-5  # torch.nn.LayerNorm default
BF16 = jnp.bfloat16
VMEM_LIMIT = 32 * 1024 * 1024


def _layernorm(x, g, b):
    # LayerNorm subclass in the reference casts to fp32; keep all LN math f32.
    x = x.astype(jnp.float32)
    mean = jnp.mean(x, axis=-1, keepdims=True)
    var = jnp.mean(jnp.square(x - mean), axis=-1, keepdims=True)
    return (x - mean) * lax.rsqrt(var + EPS) * g + b


# --------------------------------------------------------------------------
# Kernel 1: patch embedding (conv-as-matmul) + class/pos embedding + ln_pre
# --------------------------------------------------------------------------
def embed_kernel(patch_ref, w_ref, clspos_ref, ln_ref, out_ref):
    # patch_ref: (S, P) with row 0 zero-padded (class-token slot)
    # w_ref    : (P, E) flattened conv1 weight, bf16
    # clspos_ref: (S, E) = positional_embedding with class_embedding at row 0
    # ln_ref   : (2, E) = [ln_pre gamma, ln_pre beta]
    seq = jnp.dot(patch_ref[...].astype(BF16), w_ref[...],
                  preferred_element_type=jnp.float32) + clspos_ref[...]
    out_ref[...] = _layernorm(seq, ln_ref[0], ln_ref[1])


def embed_call(patches_pad, w_flat_bf16, cls_plus_pos, ln_pre):
    B, S, P = patches_pad.shape
    E = w_flat_bf16.shape[1]
    return pl.pallas_call(
        embed_kernel,
        out_shape=jax.ShapeDtypeStruct((B, S, E), jnp.float32),
        grid=(B,),
        in_specs=[
            pl.BlockSpec((None, S, P), lambda b: (b, 0, 0)),
            pl.BlockSpec((P, E), lambda b: (0, 0)),
            pl.BlockSpec((S, E), lambda b: (0, 0)),
            pl.BlockSpec((2, E), lambda b: (0, 0)),
        ],
        out_specs=pl.BlockSpec((None, S, E), lambda b: (b, 0, 0)),
        compiler_params=pltpu.CompilerParams(
            dimension_semantics=("parallel",),
            vmem_limit_bytes=VMEM_LIMIT),
    )(patches_pad, w_flat_bf16, cls_plus_pos, ln_pre)


# --------------------------------------------------------------------------
# Kernel 2: the FULL residual-attention-block stack in one pallas_call.
#   grid = (B, L); activations live in a VMEM scratch across the layer axis.
#   Packed per-layer vectors (vec_ref rows):
#     0=ln1_g 1=ln1_b 2=bq 3=bk 4=bv 5=bo 6=ln2_g 7=ln2_b 8=b_proj (rest pad)
# --------------------------------------------------------------------------
def make_stack_kernel(n_head, head_dim, n_layers):
    E = n_head * head_dim
    scale = 1.0 / math.sqrt(head_dim)

    def kernel(x_ref, wqkv_ref, wo_ref, wfc_ref, wpr_ref, vec_ref, bfc_ref,
               out_ref, x_sc):
        layer = pl.program_id(1)

        @pl.when(layer == 0)
        def _():
            x_sc[...] = x_ref[...]

        x = x_sc[...]                                      # (S, E) f32
        S = x.shape[0]
        vecs = vec_ref[...]                                # (16, E) f32

        # ---- attention (pre-LN) ----
        h = _layernorm(x, vecs[0], vecs[1])
        qkv = jnp.dot(h.astype(BF16), wqkv_ref[...],
                      preferred_element_type=jnp.float32)  # (S, 3E)
        q = qkv[:, 0 * E:1 * E] + vecs[2]
        k = qkv[:, 1 * E:2 * E] + vecs[3]
        v = qkv[:, 2 * E:3 * E] + vecs[4]

        qh = jnp.transpose(q.reshape(S, n_head, head_dim), (1, 0, 2)).astype(BF16)
        kh = jnp.transpose(k.reshape(S, n_head, head_dim), (1, 0, 2)).astype(BF16)
        vh = jnp.transpose(v.reshape(S, n_head, head_dim), (1, 0, 2)).astype(BF16)

        s = jnp.einsum("hqd,hkd->hqk", qh, kh,
                       preferred_element_type=jnp.float32) * scale
        s = s - jnp.max(s, axis=-1, keepdims=True)
        p = jnp.exp(s)
        p = p * pl.reciprocal(jnp.sum(p, axis=-1, keepdims=True), approx=True)
        o = jnp.einsum("hqk,hkd->hqd", p.astype(BF16), vh,
                       preferred_element_type=jnp.float32)  # (H, S, Dh)
        o = jnp.transpose(o, (1, 0, 2)).reshape(S, E)
        attn = jnp.dot(o.astype(BF16), wo_ref[...],
                       preferred_element_type=jnp.float32) + vecs[5]

        x = x + attn                                       # residual 1 (DropPath = Identity)

        # ---- MLP (pre-LN, QuickGELU) ----
        h2 = _layernorm(x, vecs[6], vecs[7])
        ff = jnp.dot(h2.astype(BF16), wfc_ref[...],
                     preferred_element_type=jnp.float32) + bfc_ref[0]
        ff = ff * jax.nn.sigmoid(1.702 * ff)               # QuickGELU (f32)
        ff = jnp.dot(ff.astype(BF16), wpr_ref[...],
                     preferred_element_type=jnp.float32) + vecs[8]

        x = x + ff                                         # residual 2
        x_sc[...] = x

        @pl.when(layer == n_layers - 1)
        def _():
            out_ref[...] = x

    return kernel


def transformer_stack_call(x, stacked, n_head):
    B, S, E = x.shape
    wqkv, wo, wfc, wpr, vecs, bfc = stacked
    L = wqkv.shape[0]
    F = wfc.shape[2]                                       # 4*E
    kernel = make_stack_kernel(n_head, E // n_head, L)
    return pl.pallas_call(
        kernel,
        out_shape=jax.ShapeDtypeStruct((B, S, E), jnp.float32),
        grid=(B, L),
        in_specs=[
            pl.BlockSpec((None, S, E), lambda b, l: (b, 0, 0)),       # x (fetched once per b)
            pl.BlockSpec((None, E, 3 * E), lambda b, l: (l, 0, 0)),   # fused Wqkv  (bf16)
            pl.BlockSpec((None, E, E), lambda b, l: (l, 0, 0)),       # Wo          (bf16)
            pl.BlockSpec((None, E, F), lambda b, l: (l, 0, 0)),       # W_fc        (bf16)
            pl.BlockSpec((None, F, E), lambda b, l: (l, 0, 0)),       # W_proj      (bf16)
            pl.BlockSpec((None, 16, E), lambda b, l: (l, 0, 0)),      # packed vectors (f32)
            pl.BlockSpec((None, 1, F), lambda b, l: (l, 0, 0)),       # b_fc        (f32)
        ],
        out_specs=pl.BlockSpec((None, S, E), lambda b, l: (b, 0, 0)),
        scratch_shapes=[pltpu.VMEM((S, E), jnp.float32)],             # resident activations
        compiler_params=pltpu.CompilerParams(
            dimension_semantics=("parallel", "arbitrary"),
            vmem_limit_bytes=VMEM_LIMIT),
    )(x, wqkv, wo, wfc, wpr, vecs, bfc)


# --------------------------------------------------------------------------
# Kernel 3: ln_post on the class token + output projection
# --------------------------------------------------------------------------
def head_kernel(x_ref, ln_ref, p_ref, o_ref):
    h = _layernorm(x_ref[...], ln_ref[0], ln_ref[1])
    o_ref[...] = jnp.dot(h.astype(BF16), p_ref[...],
                         preferred_element_type=jnp.float32)


def head_call(x0, ln_post, proj_bf16):
    B, E = x0.shape
    D = proj_bf16.shape[1]
    return pl.pallas_call(
        head_kernel,
        out_shape=jax.ShapeDtypeStruct((B, D), jnp.float32),
        in_specs=[
            pl.BlockSpec((B, E), lambda: (0, 0)),
            pl.BlockSpec((2, E), lambda: (0, 0)),
            pl.BlockSpec((E, D), lambda: (0, 0)),
        ],
        out_specs=pl.BlockSpec((B, D), lambda: (0, 0)),
        compiler_params=pltpu.CompilerParams(vmem_limit_bytes=VMEM_LIMIT),
    )(x0, ln_post, proj_bf16)


# --------------------------------------------------------------------------
# Parameter init (deterministic, synthetic -- shapes match the PyTorch module)
# --------------------------------------------------------------------------
def init_params(key, input_resolution, patch_size, width, layers, output_dim):
    heads = max(1, width // 64)
    n_patches = (input_resolution // patch_size) ** 2
    S = n_patches + 1
    scale = width ** -0.5

    keys = jax.random.split(key, 4 + layers)
    f32 = jnp.float32
    params = {
        "patch_size": patch_size,
        "width": width,
        "heads": heads,
        "conv_w": jax.random.normal(keys[0], (width, 3, patch_size, patch_size), f32) * 0.02,
        "cls": jax.random.normal(keys[1], (width,), f32) * scale,
        "pos": jax.random.normal(keys[2], (S, width), f32) * scale,
        "proj": jax.random.normal(keys[3], (width, output_dim), f32) * scale,
        "ln_pre_g": jnp.ones((width,), f32), "ln_pre_b": jnp.zeros((width,), f32),
        "ln_post_g": jnp.ones((width,), f32), "ln_post_b": jnp.zeros((width,), f32),
        "layers": [],
    }
    for i in range(layers):
        lk = jax.random.split(keys[4 + i], 8)
        nrm = lambda k, sh, s: jax.random.normal(k, sh, f32) * s
        layer = {
            "l1g": jnp.ones((width,), f32), "l1b": jnp.zeros((width,), f32),
            "wq": nrm(lk[0], (width, width), width ** -0.5), "bq": jnp.zeros((width,), f32),
            "wk": nrm(lk[1], (width, width), width ** -0.5), "bk": jnp.zeros((width,), f32),
            "wv": nrm(lk[2], (width, width), width ** -0.5), "bv": jnp.zeros((width,), f32),
            "wo": nrm(lk[3], (width, width), width ** -0.5), "bo": jnp.zeros((width,), f32),
            "l2g": jnp.ones((width,), f32), "l2b": jnp.zeros((width,), f32),
            "wfc": nrm(lk[4], (width, 4 * width), width ** -0.5),
            "bfc": nrm(lk[6], (4 * width,), 0.02),
            "wpr": nrm(lk[5], (4 * width, width), (4 * width) ** -0.5),
            "bpr": nrm(lk[7], (width,), 0.02),
        }
        params["layers"].append(layer)
    return params


def stack_layer_params(params):
    """Stack per-layer params into [L, ...] arrays; weights in bf16."""
    E = params["width"]
    f32 = jnp.float32
    wqkv, wo, wfc, wpr, vecs, bfc = [], [], [], [], [], []
    for lp in params["layers"]:
        wqkv.append(jnp.concatenate([lp["wq"], lp["wk"], lp["wv"]], axis=1))
        wo.append(lp["wo"])
        wfc.append(lp["wfc"])
        wpr.append(lp["wpr"])
        v = jnp.zeros((16, E), f32)
        v = v.at[:9].set(jnp.stack([lp["l1g"], lp["l1b"],
                                    lp["bq"], lp["bk"], lp["bv"], lp["bo"],
                                    lp["l2g"], lp["l2b"], lp["bpr"]]))
        vecs.append(v)
        bfc.append(lp["bfc"][None, :])
    return (jnp.stack(wqkv).astype(BF16),
            jnp.stack(wo).astype(BF16),
            jnp.stack(wfc).astype(BF16),
            jnp.stack(wpr).astype(BF16),
            jnp.stack(vecs),
            jnp.stack(bfc))


# --------------------------------------------------------------------------
# Full forward pass (Pallas kernels + thin JAX glue)
# --------------------------------------------------------------------------
def predict_transformer_forward(x_nchw, params):
    ps = params["patch_size"]
    width = params["width"]
    B, C, H, W = x_nchw.shape
    Hp, Wp = H // ps, W // ps
    P = C * ps * ps

    # --- glue: extract non-overlapping patches (matches conv1 stride=ps) ---
    patches = x_nchw.reshape(B, C, Hp, ps, Wp, ps)
    patches = patches.transpose(0, 2, 4, 1, 3, 5).reshape(B, Hp * Wp, P)
    # zero row 0 = class-token slot, so the kernel avoids an in-kernel concat
    patches_pad = jnp.concatenate(
        [jnp.zeros((B, 1, P), jnp.float32), patches], axis=1)          # (B, S, P)
    w_flat = params["conv_w"].reshape(width, P).T.astype(BF16)         # (P, E)
    cls_plus_pos = params["pos"].at[0].add(params["cls"])              # (S, E)
    ln_pre = jnp.stack([params["ln_pre_g"], params["ln_pre_b"]])       # (2, E)

    x = embed_call(patches_pad, w_flat, cls_plus_pos, ln_pre)

    stacked = stack_layer_params(params)
    x = transformer_stack_call(x, stacked, params["heads"])

    x0 = x[:, 0, :]                                                    # class token
    ln_post = jnp.stack([params["ln_post_g"], params["ln_post_b"]])
    return head_call(x0, ln_post, params["proj"].astype(BF16))


# --------------------------------------------------------------------------
# Pure-JAX reference (f32, highest precision -- correctness check only)
# --------------------------------------------------------------------------
def reference_forward(x_nchw, params):
    ps = params["patch_size"]
    heads = params["heads"]
    HI = lax.Precision.HIGHEST
    y = lax.conv_general_dilated(
        x_nchw, params["conv_w"], window_strides=(ps, ps), padding="VALID",
        dimension_numbers=("NCHW", "OIHW", "NCHW"), precision=HI)      # (B, E, Hp, Wp)
    B, E, Hp, Wp = y.shape
    y = y.reshape(B, E, Hp * Wp).transpose(0, 2, 1)                    # (B, N, E)
    cls = jnp.broadcast_to(params["cls"], (B, 1, E))
    x = jnp.concatenate([cls, y], axis=1) + params["pos"]
    x = _layernorm(x, params["ln_pre_g"], params["ln_pre_b"])

    for lp in params["layers"]:
        S = x.shape[1]
        Dh = E // heads
        h = _layernorm(x, lp["l1g"], lp["l1b"])
        q = jnp.dot(h, lp["wq"], precision=HI) + lp["bq"]
        k = jnp.dot(h, lp["wk"], precision=HI) + lp["bk"]
        v = jnp.dot(h, lp["wv"], precision=HI) + lp["bv"]
        qh = q.reshape(B, S, heads, Dh).transpose(0, 2, 1, 3)
        kh = k.reshape(B, S, heads, Dh).transpose(0, 2, 1, 3)
        vh = v.reshape(B, S, heads, Dh).transpose(0, 2, 1, 3)
        s = jnp.einsum("bhqd,bhkd->bhqk", qh, kh, precision=HI) / math.sqrt(Dh)
        s = s - jnp.max(s, axis=-1, keepdims=True)
        p = jnp.exp(s)
        p = p / jnp.sum(p, axis=-1, keepdims=True)
        a = jnp.einsum("bhqk,bhkd->bhqd", p, vh,
                       precision=HI).transpose(0, 2, 1, 3).reshape(B, S, E)
        a = jnp.dot(a, lp["wo"], precision=HI) + lp["bo"]
        x = x + a
        h2 = _layernorm(x, lp["l2g"], lp["l2b"])
        ff = jnp.dot(h2, lp["wfc"], precision=HI) + lp["bfc"]
        ff = ff * jax.nn.sigmoid(1.702 * ff)
        ff = jnp.dot(ff, lp["wpr"], precision=HI) + lp["bpr"]
        x = x + ff

    x0 = _layernorm(x[:, 0, :], params["ln_post_g"], params["ln_post_b"])
    return jnp.dot(x0, params["proj"], precision=HI)


if __name__ == "__main__":
    B = 2
    input_resolution = 16
    patch_size = 8
    width = 64          # heads = width // 64 = 1
    layers = 2
    output_dim = 32

    key = jax.random.PRNGKey(0)
    kx, kp = jax.random.split(key)
    x = jax.random.normal(kx, (B, 3, input_resolution, input_resolution), jnp.float32)
    params = init_params(kp, input_resolution, patch_size, width, layers, output_dim)

    out = predict_transformer_forward(x, params)
    out = jax.block_until_ready(out)
    assert out.shape == (B, output_dim), out.shape

    ref = reference_forward(x, params)
    err = float(jnp.max(jnp.abs(out - ref)))
    # bf16 matmul inputs (f32 accumulation) -> tolerance relaxed vs f32 reference.
    assert jnp.allclose(out, ref, atol=5e-2, rtol=5e-2), f"max abs err {err}"

    print("KERNEL_OK")
</pallas_src>

<mosaic_0001>
module attributes {stable_mosaic.version = 11 : i64} {
  func.func @embed_kernel(%arg0: i32, %arg1: memref<1x5x192xf32, #tpu.memory_space<vmem>>, %arg2: memref<192x64xbf16, #tpu.memory_space<vmem>>, %arg3: memref<5x64xf32, #tpu.memory_space<vmem>>, %arg4: memref<2x64xf32, #tpu.memory_space<vmem>>, %arg5: memref<1x5x64xf32, #tpu.memory_space<vmem>>) attributes {dimension_semantics = [#tpu.dimension_semantics<parallel>], iteration_bounds = array<i64: 2>, scalar_prefetch = 0 : i64, scratch_operands = 0 : i64, tpu.core_type = #tpu.core_type<tc>, window_params = [{transform_indices = @transform_0, window_bounds = array<i64: 1, 5, 192>}, {pipeline_mode = #tpu.pipeline_mode<synchronous>, transform_indices = @transform_1, window_bounds = array<i64: 192, 64>}, {pipeline_mode = #tpu.pipeline_mode<synchronous>, transform_indices = @transform_2, window_bounds = array<i64: 5, 64>}, {pipeline_mode = #tpu.pipeline_mode<synchronous>, transform_indices = @transform_3, window_bounds = array<i64: 2, 64>}, {transform_indices = @transform_4, window_bounds = array<i64: 1, 5, 64>}]} {
    %c0 = arith.constant 0 : index
    %c0_0 = arith.constant 0 : index
    %c0_1 = arith.constant 0 : index
    %0 = vector.load %arg1[%c0, %c0_0, %c0_1] : memref<1x5x192xf32, #tpu.memory_space<vmem>>, vector<1x5x192xf32>
    %1 = vector.shape_cast %0 : vector<1x5x192xf32> to vector<5x192xf32>
    %2 = arith.truncf %1 : vector<5x192xf32> to vector<5x192xbf16>
    %c0_2 = arith.constant 0 : index
    %c0_3 = arith.constant 0 : index
    %3 = vector.load %arg2[%c0_2, %c0_3] : memref<192x64xbf16, #tpu.memory_space<vmem>>, vector<192x64xbf16>
    %cst = arith.constant dense<0.000000e+00> : vector<5x64xf32>
    %4 = tpu.matmul %2, %3, %cst {dimension_numbers = #tpu.dot_dimension_numbers<[1], [0], [0], [1], [0, 0, 1, 1], [], []>} : vector<5x192xbf16>, vector<192x64xbf16>, vector<5x64xf32> -> vector<5x64xf32>
    %c0_4 = arith.constant 0 : index
    %c0_5 = arith.constant 0 : index
    %5 = vector.load %arg3[%c0_4, %c0_5] : memref<5x64xf32, #tpu.memory_space<vmem>>, vector<5x64xf32>
    %6 = arith.addf %4, %5 : vector<5x64xf32>
    %c0_6 = arith.constant 0 : index
    %c0_7 = arith.constant 0 : index
    %7 = vector.load %arg4[%c0_6, %c0_7] : memref<2x64xf32, #tpu.memory_space<vmem>>, vector<1x64xf32>
    %8 = vector.shape_cast %7 : vector<1x64xf32> to vector<64xf32>
    %c1 = arith.constant 1 : index
    %c0_8 = arith.constant 0 : index
    %9 = vector.load %arg4[%c1, %c0_8] : memref<2x64xf32, #tpu.memory_space<vmem>>, vector<1x64xf32>
    %10 = vector.shape_cast %9 : vector<1x64xf32> to vector<64xf32>
    %cst_9 = arith.constant dense<0.000000e+00> : vector<5xf32>
    %11 = vector.multi_reduction <add>, %6, %cst_9 [1] : vector<5x64xf32> to vector<5xf32>
    %12 = vector.shape_cast %11 : vector<5xf32> to vector<5x1xf32>
    %cst_10 = arith.constant 6.400000e+01 : f32
    %13 = vector.broadcast %cst_10 : f32 to vector<5x1xf32>
    %14 = arith.divf %12, %13 : vector<5x1xf32>
    %15 = vector.broadcast %14 : vector<5x1xf32> to vector<5x64xf32>
    %16 = arith.subf %6, %15 : vector<5x64xf32>
    %17 = arith.mulf %16, %16 : vector<5x64xf32>
    %cst_11 = arith.constant dense<0.000000e+00> : vector<5xf32>
    %18 = vector.multi_reduction <add>, %17, %cst_11 [1] : vector<5x64xf32> to vector<5xf32>
    %19 = vector.shape_cast %18 : vector<5xf32> to vector<5x1xf32>
    %cst_12 = arith.constant 6.400000e+01 : f32
    %20 = vector.broadcast %cst_12 : f32 to vector<5x1xf32>
    %21 = arith.divf %19, %20 : vector<5x1xf32>
    %22 = vector.broadcast %14 : vector<5x1xf32> to vector<5x64xf32>
    %23 = arith.subf %6, %22 : vector<5x64xf32>
    %cst_13 = arith.constant 9.99999974E-6 : f32
    %24 = vector.broadcast %cst_13 : f32 to vector<5x1xf32>
    %25 = arith.addf %21, %24 : vector<5x1xf32>
    %26 = math.rsqrt %25 : vector<5x1xf32>
    %27 = vector.broadcast %26 : vector<5x1xf32> to vector<5x64xf32>
    %28 = arith.mulf %23, %27 : vector<5x64xf32>
    %29 = vector.shape_cast %8 : vector<64xf32> to vector<1x64xf32>
    %30 = vector.broadcast %29 : vector<1x64xf32> to vector<5x64xf32>
    %31 = arith.mulf %28, %30 : vector<5x64xf32>
    %32 = vector.shape_cast %10 : vector<64xf32> to vector<1x64xf32>
    %33 = vector.broadcast %32 : vector<1x64xf32> to vector<5x64xf32>
    %34 = arith.addf %31, %33 : vector<5x64xf32>
    %c0_14 = arith.constant 0 : index
    %c0_15 = arith.constant 0 : index
    %c0_16 = arith.constant 0 : index
    %35 = vector.load %arg5[%c0_14, %c0_15, %c0_16] : memref<1x5x64xf32, #tpu.memory_space<vmem>>, vector<1x5x64xf32>
    %36 = vector.shape_cast %35 : vector<1x5x64xf32> to vector<5x64xf32>
    %37 = vector.shape_cast %34 : vector<5x64xf32> to vector<1x5x64xf32>
    tpu.vector_store %arg5[%c0_14, %c0_15, %c0_16], %37 {strides = array<i32>} : memref<1x5x64xf32, #tpu.memory_space<vmem>>, vector<1x5x64xf32>,
    return
  }
  func.func @transform_0(%arg0: i32) -> (i32, i32, i32) {
    %c0_i32 = arith.constant 0 : i32
    %c0_i32_0 = arith.constant 0 : i32
    %c0_i32_1 = arith.constant 0 : i32
    return %arg0, %c0_i32, %c0_i32_0 : i32, i32, i32
  }
  func.func @transform_1(%arg0: i32) -> (i32, i32) {
    %c0_i32 = arith.constant 0 : i32
    %c0_i32_0 = arith.constant 0 : i32
    %c0_i32_1 = arith.constant 0 : i32
    return %c0_i32, %c0_i32_0 : i32, i32
  }
  func.func @transform_2(%arg0: i32) -> (i32, i32) {
    %c0_i32 = arith.constant 0 : i32
    %c0_i32_0 = arith.constant 0 : i32
    %c0_i32_1 = arith.constant 0 : i32
    return %c0_i32, %c0_i32_0 : i32, i32
  }
  func.func @transform_3(%arg0: i32) -> (i32, i32) {
    %c0_i32 = arith.constant 0 : i32
    %c0_i32_0 = arith.constant 0 : i32
    %c0_i32_1 = arith.constant 0 : i32
    return %c0_i32, %c0_i32_0 : i32, i32
  }
  func.func @transform_4(%arg0: i32) -> (i32, i32, i32) {
    %c0_i32 = arith.constant 0 : i32
    %c0_i32_0 = arith.constant 0 : i32
    %c0_i32_1 = arith.constant 0 : i32
    return %arg0, %c0_i32, %c0_i32_0 : i32, i32, i32
  }
}

</mosaic_0001>

<bundles_post_ra>
// kernel: tpu_custom_call.1
= control target key start
LH: loop header
LB: loop body
LE: loop exit
PB: predicated region body
PF: predicated region fallthrough
CT: control target
= control target key end

     0   :  { %s506_s15 = smov 0   ;;  %s579_s0 = inlined_call_operand.vmem [shape: f32[2,5,192], index: 0, kind: input, shape index: {}]   ;;  %s580_s1 = inlined_call_operand.vmem [shape: bf16[192,64], index: 1, kind: input, shape index: {}]   ;;  %s581_s2 = inlined_call_operand.vmem [shape: f32[5,64], index: 2, kind: input, shape index: {}]   ;;  %s582_s3 = inlined_call_operand.vmem [shape: f32[2,64], index: 3, kind: input, shape index: {}]   ;;  %s583_s4 = inlined_call_operand.vmem [shape: f32[2,5,64], index: 4, kind: output, shape index: {}]  }
   0x1 LB: > { %s423_s16 = sadd.s32 4294967295, %s478_s15   ;;  %p427_p0 = scmp.ge.s32.totalorder %s478_s15, 1  ;;  %s478_s15 = sphi %s506_s15, %s14_s15  }
   0x2   : > { %p162_p1 = scmp.lt.s32.totalorder %s478_s15, 3 }
   0x4   : > { %p163_p2 = pnand %p427_p0, %p162_p1 }
   0x5   : > { %v458_v0 = vld [vmem:[%s580_s1] sm:$0xff] (!%p163_p2)   ;;  %v480_v1 = vmov (!%p163_p2), 0   ;;  %p187_p3 = scmp.lt.s32.totalorder (!%p163_p2), %s423_s16, 1  ;;  %v459_v2 = vld [vmem:[%s580_s1 + $0x8] sm:$0xff] (!%p163_p2)   ;;  %v460_v3 = vld [vmem:[%s580_s1 + $0x10] sm:$0xff] (!%p163_p2)   ;;  %vm298_vm0 = vcmask (!%p163_p2), 523264  }
   0x6   : > { %166 = sbr.rel (%p163_p2) target bundleno = 582 (0x246), region = 36  ;;  %302 = vmatprep.subr.bf16.mxu0 (!%p163_p2), %v480_v1  ;;  %v461_v4 = vld [vmem:[%s580_s1 + $0x18] sm:$0xff] (!%p163_p2)   ;;  %v462_v7 = vld [vmem:[%s580_s1 + $0x20] sm:$0xff] (!%p163_p2)   ;;  %v463_v8 = vld [vmem:[%s580_s1 + $0x28] sm:$0xff] (!%p163_p2)   ;;  %vm344_vm1 = vcmask (!%p163_p2), 520192  }
   0x7   : > { %303 = vmatpush1.bf16.msra.mxu0 (!%p163_p2), %v458_v0  ;;  %v464_v9 = vld [vmem:[%s580_s1 + $0x30] sm:$0xff] (!%p163_p2)   ;;  %v465_v10 = vld [vmem:[%s580_s1 + $0x38] sm:$0xff] (!%p163_p2)   ;;  %v466_v11 = vld [vmem:[%s580_s1 + $0x40] sm:$0xff] (!%p163_p2)  }
   0x8   : > { %304 = vmatprep.subr.bf16.mxu0 (!%p163_p2), %v480_v1  ;;  %v467_v12 = vld [vmem:[%s580_s1 + $0x48] sm:$0xff] (!%p163_p2)   ;;  %v468_v13 = vld [vmem:[%s580_s1 + $0x50] sm:$0xff] (!%p163_p2)   ;;  %v469_v14 = vld [vmem:[%s580_s1 + $0x58] sm:$0xff] (!%p163_p2)  }
   0x9   : > { %v225_v17 = vld [vmem:[%s581_s2] sm:$0x1f] (!%p163_p2) }
   0xa   : > { %v444_v33 = vld [vmem:[%s582_s3] ss:$0 sm:$0xff] (!%p163_p2)  ;;  %v445_v35 = vld [vmem:[%s582_s3 + $0x1] ss:$0 sm:$0xff] (!%p163_p2) }
   0xb   : > { %305 = vmatpush1.bf16.msra.mxu0 (!%p163_p2), %v459_v2 }
   0xc   : > { %306 = vmatprep.subr.bf16.mxu0 (!%p163_p2), %v480_v1 }
   0xd   : > { %s585_s16 = smov (!%p187_p3, %s423_s16), 1 }
   0xe   : > { %s448_s23 = sshll.u32 %s585_s16, 4  ;;  %s430_s25 = sshll.u32 %s585_s16, 3 }
   0xf   : > { %s529_s26 = scalar_lea.vmem %s579_s0, %s448_s23  ;;  %307 = vmatpush1.bf16.msra.mxu0 %v460_v3  ;;  %s195_s30 = scalar_lea.vmem %s583_s4, %s430_s25 }
  0x10   : > { %308 = vmatprep.subr.bf16.mxu0 %v480_v1  ;;  %v198_v5 = vld [vmem:[%s529_s26 + $0x8] sm:$0x1f]  ;;  %v197_v15 = vld [vmem:[%s529_s26] sm:$0x1f] }
  0x11   : > { %v200_v6 = vpack.c.bf16 %v198_v5, %v198_v5  ;;  %v199_v16 = vpack.c.bf16 %v197_v15, %v197_v15 }
  0x13   : > { %309 = vmatpush1.bf16.msra.mxu0 %v461_v4  ;;  %443 = vmatprep.mubr.msk.bf16.mxu0 %vm298_vm0, %v200_v6 }
  0x14   : > { %310 = vmatprep.subr.bf16.mxu0 %v480_v1 }
  0x17   : > { %311 = vmatpush1.bf16.msra.mxu0 %v462_v7 }
  0x18   : > { %312 = vmatprep.subr.bf16.mxu0 %v480_v1 }
  0x1b   : > { %313 = vmatpush1.bf16.msra.mxu0 %v463_v8 }
  0x1c   : > { %314 = vmatprep.subr.bf16.mxu0 %v480_v1 }
  0x1f   : > { %315 = vmatpush1.bf16.msra.mxu0 %v464_v9 }
  0x20   : > { %316 = vmatprep.subr.bf16.mxu0 %v480_v1 }
  0x23   : > { %317 = vmatpush1.bf16.msra.mxu0 %v465_v10 }
  0x24   : > { %318 = vmatprep.subr.bf16.mxu0 %v480_v1 }
  0x27   : > { %319 = vmatpush1.bf16.msra.mxu0 %v466_v11 }
  0x28   : > { %320 = vmatprep.subr.bf16.mxu0 %v480_v1 }
  0x2b   : > { %321 = vmatpush1.bf16.msra.mxu0 %v467_v12 }
  0x2c   : > { %322 = vmatprep.subr.bf16.mxu0 %v480_v1 }
  0x2f   : > { %323 = vmatpush1.bf16.msra.mxu0 %v468_v13 }
  0x30   : > { %324 = vmatprep.subr.bf16.mxu0 %v480_v1 }
  0x33   : > { %325 = vmatpush1.bf16.msra.mxu0 %v469_v14 }
  0x36   : > { %335 = vmatmul.mubr.bf16.vlgmr.msra.gmra.mrb[0].mxu0 %v199_v16 }
 0x109   : > { %v336_v18 = vpop.f32.mrb[0].mxu0 }
 0x10a   : > { %v337_v19 = vadd.f32 %v336_v18, %v225_v17  ;;  %v338_v20 = vpop.f32.mrb[1].mxu0 }
 0x10b   : > { %v339_v21 = vpop.f32.mrb[2].mxu0 }
 0x10c   : > { %v340_v22 = vpop.f32.mrb[3].mxu0  ;;  %v345_v23 = vsel %vm344_vm1, %v337_v19, 0.0 }
 0x10d   : > { %346 = vadd.xlane.f32.xlu0 %v345_v23 }
 0x19a   : > { %v347_v24 = vpop.xlane.xlu0 %346 }
 0x19b   : > { %v349_v25 = vmul.f32 0.015625, %v347_v24 }
 0x19d   : > { %v350_v26 = vsub.f32 %v337_v19, %v349_v25 }
 0x19f   : > { %v351_v27 = vmul.f32 %v350_v26, %v350_v26 }
 0x1a1   : > { %v352_v28 = vsel %vm344_vm1, %v351_v27, 0.0 }
 0x1a2   : > { %353 = vadd.xlane.f32.xlu0 %v352_v28 }
 0x22f   : > { %v354_v29 = vpop.xlane.xlu0 %353 }
 0x230   : > { %v355_v30 = vmul.f32 0.015625, %v354_v29 }
 0x232   : > { %v356_v31 = vadd.f32 1e-05, %v355_v30 }
 0x234   : > { %470 = vrsqrt.f32 %v356_v31 }
 0x23e   : > { %v471_v32 = vpop.eup %470 }
 0x23f   : > { %v358_v34 = vmul.f32 %v471_v32, %v350_v26 }
 0x241   : > { %v363_v36 = vmul.f32 %v444_v33, %v358_v34 }
 0x243   : > { %v368_v37 = vadd.f32 %v445_v35, %v363_v36 }
 0x245   : > { %369 = vst.msk [vmem:[%s195_s30] sm:$0x1f] %vm344_vm1, %v368_v37 }
 0x246 PF: > { %s14_s15 = sadd.s32 1, %s478_s15  }
 0x247   : > { %p11_p4 = scmp.ge.s32.totalorder %s14_s15, 4  }
 0x249   :  { %13 = sbr.rel (!%p11_p4) target bundleno = 1 (0x1), region = 66 }

</bundles_post_ra>
